<compile_context>
chip_gen: v6e
topology: v6e:2x2x1
jax: 0.10.0
libtpu: 0.0.40
codegen_flags: <defaults>
</compile_context>

<pallas_src>
import jax
import jax.numpy as jnp
from jax import lax
from jax.experimental import pallas as pl
from jax.experimental.pallas import tpu as pltpu


def _linear_classifier_kernel(x_ref, w_ref, b_ref, o_ref):
    # x_ref: (tm, C)   -- one tile of tokens, channels on the lane axis
    # w_ref: (N, C)    -- full weight, resident across the grid
    # b_ref: (N, 1)    -- bias as a column, broadcast across lanes
    # o_ref: (N, tm)   -- lane-dense output tile (tokens on the lane axis)
    acc = lax.dot_general(
        w_ref[...], x_ref[...],
        dimension_numbers=(((1,), (1,)), ((), ())),   # contract over C
        preferred_element_type=jnp.float32)
    o_ref[...] = (acc + b_ref[...]).astype(o_ref.dtype)


def linear_classifier_forward(embeddings, weight, bias, token_h, token_w,
                              *, tm=512):
    """
    embeddings: (B, H*W, C)
    weight:     (num_labels, C)   (torch Conv2d 1x1 weight squeezed)
    bias:       (num_labels,)
    returns:    (B, num_labels, H, W)
    """
    B, HW, C = embeddings.shape
    assert HW == token_h * token_w
    N = weight.shape[0]

    # Token tile: must be a multiple of 128 (lane axis of the output).
    # Shrink it for small inputs so we don't pad more than necessary.
    tm_eff = min(tm, max(128, pl.cdiv(HW, 128) * 128))
    tm_eff = max(128, (tm_eff // 128) * 128)
    HW_pad = pl.cdiv(HW, tm_eff) * tm_eff

    x = embeddings
    if HW_pad != HW:
        # Zero-pad ragged token counts; padded rows are sliced off below.
        x = jnp.pad(x, ((0, 0), (0, HW_pad - HW), (0, 0)))

    w = weight                      # (N, C)
    b2d = bias.reshape(N, 1)        # (N, 1) column -> lane-broadcast in kernel

    itemsize = jnp.dtype(embeddings.dtype).itemsize
    cost = pl.CostEstimate(
        flops=2 * B * HW_pad * C * N,
        transcendentals=0,
        bytes_accessed=(B * HW_pad * C + N * C + N) * itemsize
                       + B * N * HW_pad * itemsize)

    out_flat = pl.pallas_call(
        _linear_classifier_kernel,
        out_shape=jax.ShapeDtypeStruct((B, N, HW_pad), embeddings.dtype),
        grid_spec=pltpu.PrefetchScalarGridSpec(
            num_scalar_prefetch=0,
            grid=(B, HW_pad // tm_eff),
            in_specs=[
                # x: (B, HW_pad, C), batch dim squeezed out of the kernel view
                pl.BlockSpec((None, tm_eff, C), lambda b, i: (b, i, 0)),
                # full weight, same block every step (stays resident)
                pl.BlockSpec((N, C), lambda b, i: (0, 0)),
                # bias column
                pl.BlockSpec((N, 1), lambda b, i: (0, 0)),
            ],
            # Fused NCHW layout: write (N, tm) tiles directly into (B, N, HW).
            out_specs=pl.BlockSpec((None, N, tm_eff), lambda b, i: (b, 0, i)),
        ),
        compiler_params=pltpu.CompilerParams(
            dimension_semantics=("parallel", "parallel")),
        cost_estimate=cost,
    )(x, w, b2d)

    if HW_pad != HW:
        out_flat = out_flat[:, :, :HW]
    # Free reshape -- no transpose needed, kernel already wrote channel-major.
    return out_flat.reshape(B, N, token_h, token_w)


def _reference_forward(embeddings, weight, bias, token_h, token_w):
    # Pure-JAX reference of the PyTorch module forward.
    B, HW, C = embeddings.shape
    x = embeddings.reshape(B, token_h, token_w, C)
    out = jnp.einsum("bhwc,nc->bnhw", x, weight) + bias[None, :, None, None]
    return out


if __name__ == "__main__":
    key = jax.random.PRNGKey(0)
    k_x, k_w, k_b = jax.random.split(key, 3)

    # --- case 1: tile-aligned token grid ---------------------------------
    B, token_h, token_w = 2, 16, 16
    in_channels, num_labels = 32, 8

    embeddings = jax.random.normal(
        k_x, (B, token_h * token_w, in_channels), dtype=jnp.float32)
    weight = jax.random.normal(
        k_w, (num_labels, in_channels), dtype=jnp.float32) * 0.05
    bias = jax.random.normal(k_b, (num_labels,), dtype=jnp.float32) * 0.01

    out = linear_classifier_forward(embeddings, weight, bias, token_h, token_w)
    out = jax.block_until_ready(out)
    ref = _reference_forward(embeddings, weight, bias, token_h, token_w)
    assert out.shape == (B, num_labels, token_h, token_w), out.shape
    assert jnp.allclose(out, ref, atol=1e-4, rtol=1e-4), "mismatch (aligned)"

    # --- case 2: ragged token grid (H*W not a multiple of 128) ------------
    th2, tw2 = 13, 13
    emb2 = jax.random.normal(
        k_x, (B, th2 * tw2, in_channels), dtype=jnp.float32)
    out2 = linear_classifier_forward(emb2, weight, bias, th2, tw2)
    out2 = jax.block_until_ready(out2)
    ref2 = _reference_forward(emb2, weight, bias, th2, tw2)
    assert out2.shape == (B, num_labels, th2, tw2), out2.shape
    assert jnp.allclose(out2, ref2, atol=1e-4, rtol=1e-4), "mismatch (ragged)"

    print("KERNEL_OK")
</pallas_src>

<mosaic_0001>
module attributes {stable_mosaic.version = 11 : i64} {
  func.func @_linear_classifier_kernel(%arg0: i32, %arg1: i32, %arg2: memref<1x256x32xf32, #tpu.memory_space<vmem>>, %arg3: memref<8x32xf32, #tpu.memory_space<vmem>>, %arg4: memref<8x1xf32, #tpu.memory_space<vmem>>, %arg5: memref<1x8x256xf32, #tpu.memory_space<vmem>>) attributes {dimension_semantics = [#tpu.dimension_semantics<parallel>, #tpu.dimension_semantics<parallel>], iteration_bounds = array<i64: 2, 1>, scalar_prefetch = 0 : i64, scratch_operands = 0 : i64, tpu.core_type = #tpu.core_type<tc>, window_params = [{transform_indices = @transform_0, window_bounds = array<i64: 1, 256, 32>}, {pipeline_mode = #tpu.pipeline_mode<synchronous>, transform_indices = @transform_1, window_bounds = array<i64: 8, 32>}, {pipeline_mode = #tpu.pipeline_mode<synchronous>, transform_indices = @transform_2, window_bounds = array<i64: 8, 1>}, {transform_indices = @transform_3, window_bounds = array<i64: 1, 8, 256>}]} {
    %c0 = arith.constant 0 : index
    %c0_0 = arith.constant 0 : index
    %0 = vector.load %arg3[%c0, %c0_0] : memref<8x32xf32, #tpu.memory_space<vmem>>, vector<8x32xf32>
    %c0_1 = arith.constant 0 : index
    %c0_2 = arith.constant 0 : index
    %c0_3 = arith.constant 0 : index
    %1 = vector.load %arg2[%c0_1, %c0_2, %c0_3] : memref<1x256x32xf32, #tpu.memory_space<vmem>>, vector<1x256x32xf32>
    %2 = vector.shape_cast %1 : vector<1x256x32xf32> to vector<256x32xf32>
    %cst = arith.constant dense<0.000000e+00> : vector<8x256xf32>
    %3 = tpu.matmul %0, %2, %cst {dimension_numbers = #tpu.dot_dimension_numbers<[1], [1], [0], [0], [0, 0, 1, 0], [], []>} : vector<8x32xf32>, vector<256x32xf32>, vector<8x256xf32> -> vector<8x256xf32>
    %c0_4 = arith.constant 0 : index
    %c0_5 = arith.constant 0 : index
    %4 = vector.load %arg4[%c0_4, %c0_5] : memref<8x1xf32, #tpu.memory_space<vmem>>, vector<8x1xf32>
    %5 = vector.broadcast %4 : vector<8x1xf32> to vector<8x256xf32>
    %6 = arith.addf %3, %5 : vector<8x256xf32>
    %c0_6 = arith.constant 0 : index
    %c0_7 = arith.constant 0 : index
    %c0_8 = arith.constant 0 : index
    %7 = vector.load %arg5[%c0_6, %c0_7, %c0_8] : memref<1x8x256xf32, #tpu.memory_space<vmem>>, vector<1x8x256xf32>
    %8 = vector.shape_cast %7 : vector<1x8x256xf32> to vector<8x256xf32>
    %9 = vector.shape_cast %6 : vector<8x256xf32> to vector<1x8x256xf32>
    tpu.vector_store %arg5[%c0_6, %c0_7, %c0_8], %9 {strides = array<i32>} : memref<1x8x256xf32, #tpu.memory_space<vmem>>, vector<1x8x256xf32>,
    return
  }
  func.func @transform_0(%arg0: i32, %arg1: i32) -> (i32, i32, i32) {
    %c0_i32 = arith.constant 0 : i32
    %c0_i32_0 = arith.constant 0 : i32
    return %arg0, %arg1, %c0_i32 : i32, i32, i32
  }
  func.func @transform_1(%arg0: i32, %arg1: i32) -> (i32, i32) {
    %c0_i32 = arith.constant 0 : i32
    %c0_i32_0 = arith.constant 0 : i32
    %c0_i32_1 = arith.constant 0 : i32
    return %c0_i32, %c0_i32_0 : i32, i32
  }
  func.func @transform_2(%arg0: i32, %arg1: i32) -> (i32, i32) {
    %c0_i32 = arith.constant 0 : i32
    %c0_i32_0 = arith.constant 0 : i32
    %c0_i32_1 = arith.constant 0 : i32
    return %c0_i32, %c0_i32_0 : i32, i32
  }
  func.func @transform_3(%arg0: i32, %arg1: i32) -> (i32, i32, i32) {
    %c0_i32 = arith.constant 0 : i32
    %c0_i32_0 = arith.constant 0 : i32
    return %arg0, %c0_i32, %arg1 : i32, i32, i32
  }
}

</mosaic_0001>

<bundles_post_ra>
// kernel: tpu_custom_call.1
= control target key start
LH: loop header
LB: loop body
LE: loop exit
PB: predicated region body
PF: predicated region fallthrough
CT: control target
= control target key end

     0   :  { %8 = vsyncpa [#allocation3], 0  ;;  %s921_s0 = inlined_call_operand.vmem [shape: f32[2,256,32], index: 0, kind: input, shape index: {}]   ;;  %s922_s1 = inlined_call_operand.vmem [shape: f32[8,32], index: 1, kind: input, shape index: {}]   ;;  %s923_s2 = inlined_call_operand.vmem [shape: f32[8,1], index: 2, kind: input, shape index: {}]   ;;  %s924_s3 = inlined_call_operand.hbm [shape: f32[2,8,256], index: 3, kind: output, shape index: {}]  }
   0x1   :  { %10 = vsyncpa [#allocation3 + $0x1], 0  ;;  %s744_s12 = smov 0   ;;  %s746_s13 = smov 0  }
   0x2   :  { %s748_s14 = smov 0   ;;  %s750_s15 = smov 0  }
   0x3   :  { %s752_s16 = smov 0   ;;  %s754_s17 = smov 0  }
   0x4 LB: > { %s505_s18 = sadd.s32 4294967295, %s720_s17   ;;  %s506_s19 = sadd.s32 4294967294, %s720_s17   ;;  %s720_s17 = sphi %s754_s17, %s16_s17   ;;  %s716_s16 = sphi %s752_s16, %s931_s16   ;;  %s712_s15 = sphi %s750_s15, %s930_s15   ;;  %s708_s14 = sphi %s748_s14, %s929_s14   ;;  %s704_s13 = sphi %s746_s13, %s928_s13   ;;  %s700_s12 = sphi %s744_s12, %s927_s12  }
   0x5   : > { %s28_s20 = sadd.s32 1, %s716_s16  ;;  %s107_s21 = sadd.s32 1, %s708_s14 }
   0x6   : > { %p30_p0 = scmp.ge.s32.totalorder %s28_s20, 2  ;;  %p117_p1 = scmp.ne.s32.totalorder %s708_s14, %s704_s13 }
   0x7   : > { %p118_p2 = scmp.eq.s32.totalorder %s505_s18, 1  ;;  %p123_p3 = scmp.ne.s32.totalorder %s704_s13, %s700_s12 }
   0x8   : > { %s933_s20 = smov (%p30_p0, %s28_s20), 0  ;;  %p124_p5 = scmp.eq.s32.totalorder %s506_s19, 1 }
   0x9   : > { %p784_p4 = por %p118_p2, %p117_p1  ;;  %s102_s23 = ssub.s32 %s716_s16, %s933_s20 }
   0xa   : > { %p509_p6 = scmp.ge.s32.totalorder %s720_s17, 1  ;;  %p105_p7 = scmp.eq.s32.totalorder %s102_s23, 0 }
   0xb   : > { %p791_p8 = por %p124_p5, %p123_p3  ;;  %p161_p9 = scmp.lt.s32.totalorder %s720_s17, 3 }
   0xc   : > { %s797_s25 = scalar_select %p105_p7, %s708_s14, %s107_s21  }
   0xd   : > { %p162_p10 = pnand %p509_p6, %p161_p9 }
   0xe   : > { %p190_p11 = scmp.lt.s32.totalorder (!%p162_p10), %s712_s15, 1  ;;  %s186_s8 = sand.u32 (!%p162_p10), 1, %s704_s13  }
   0xf   : > { %165 = sbr.rel (%p162_p10) target bundleno = 299 (0x12b), region = 32  ;;  %s510_s9 = sshll.u32 (!%p162_p10), %s186_s8, 4 }
  0x10   : > { %s552_s10 = sshll.u32 (!%p162_p10), %s712_s15, 8  ;;  %s188_s11 = scalar_lea.vmem (!%p162_p10), [#allocation2], %s510_s9 }
  0x11   : > { %s429_s18 = sshll.u32 (!%p162_p10), %s188_s11, 4  ;;  %s427_s23 = scalar_lea.hbm (!%p162_p10), %s924_s3, %s552_s10  ;;  %s430_s18 = int_to_ptr.vmem [resolvable:$true] %s429_s18 }
  0x12   : > { %s413_s26 = scalar_lea.sflag (!%p162_p10), [#allocation3], %s186_s8  ;;  %s644_s27 = scalar_lea.vmem (!%p162_p10), %s430_s18, 256 }
  0x13   : > { %p645_p12 = scmp.ne.s32.totalorder (!%p162_p10), %s430_s18, %s644_s27  ;;  %s723_s28 = smov (!%p162_p10), [#allocation2]  }
  0x14   : > { %vm239_vm0 = vcmask 261120   ;;  %v803_v0 = vld [vmem:[%s922_s1] sm:$0xff]  ;;  %v722_v2 = vmov 0   ;;  %s191_s30 = scalar_select %p190_p11, %s712_s15, 1 }
  0x15   : > { %v233_v1 = vld [vmem:[%s923_s2] sm:$0xff]  ;;  %585 = vmatprep.mubr.msk.f32.mxu0 %vm239_vm0, %v803_v0  ;;  %643 = vset.pattern.permute.xlu0 %v722_v2  ;;  %p646_p13 = pnand %p645_p12, %p784_p4  ;;  %s648_s15 = sshll.u32 %s723_s28, 4  ;;  %s649_s15 = int_to_ptr.vmem [resolvable:$false] %s648_s15 }
  0x16   : > { %236 = vperm.xlu0 %643, %v233_v1   ;;  %s551_s4 = sshll.u32 %s191_s30, 8  ;;  %s650_s29 = scalar_lea.vmem %s649_s15, 512 }
  0x17   : > { %s814_s7 = scalar_lea.vmem %s921_s0, %s551_s4  ;;  %p647_p0 = pneg %p646_p13 }
  0x18   : > { %v232_v3 = vld [vmem:[%s814_s7 + $0xf8] sm:$0xff]  ;;  %v231_v5 = vld [vmem:[%s814_s7 + $0xf0] sm:$0xff]  ;;  %v230_v7 = vld [vmem:[%s814_s7 + $0xe8] sm:$0xff]  ;;  %p651_p1 = scmp.lt.s32.totalorder %s430_s18, %s649_s15  ;;  %p652_p2 = scmp.lt.s32.totalorder %s650_s29, %s644_s27 }
  0x19   : > { %v216_v4 = vld [vmem:[%s814_s7 + $0x78] sm:$0xff]  ;;  %553 = vmatprep.subr.msk.mxu0 %vm239_vm0, %v232_v3  ;;  %v215_v6 = vld [vmem:[%s814_s7 + $0x70] sm:$0xff]  ;;  %v214_v8 = vld [vmem:[%s814_s7 + $0x68] sm:$0xff] }
  0x1a   : > { %554 = vmatpush3.xpose.msk.msra.mxu0 %vm239_vm0, %v216_v4  ;;  %v229_v9 = vld [vmem:[%s814_s7 + $0xe0] sm:$0xff]  ;;  %v228_v11 = vld [vmem:[%s814_s7 + $0xd8] sm:$0xff]  ;;  %v227_v13 = vld [vmem:[%s814_s7 + $0xd0] sm:$0xff]  ;;  %p653_p3 = por %p652_p2, %p651_p1 }
  0x1b   : > { %555 = vmatprep.subr.msk.mxu0 %vm239_vm0, %v231_v5  ;;  %v213_v10 = vld [vmem:[%s814_s7 + $0x60] sm:$0xff]  ;;  %v212_v12 = vld [vmem:[%s814_s7 + $0x58] sm:$0xff]  ;;  %v211_v14 = vld [vmem:[%s814_s7 + $0x50] sm:$0xff] }
  0x1c   : > { %v226_v15 = vld [vmem:[%s814_s7 + $0xc8] sm:$0xff]  ;;  %v225_v17 = vld [vmem:[%s814_s7 + $0xc0] sm:$0xff]  ;;  %v224_v19 = vld [vmem:[%s814_s7 + $0xb8] sm:$0xff]  ;;  %p654_p5 = pnand %p653_p3, %p647_p0 }
  0x1d   : > { %v210_v16 = vld [vmem:[%s814_s7 + $0x48] sm:$0xff]  ;;  %v209_v18 = vld [vmem:[%s814_s7 + $0x40] sm:$0xff]  ;;  %v208_v20 = vld [vmem:[%s814_s7 + $0x38] sm:$0xff] }
  0x1e   : > { %556 = vmatpush3.xpose.msk.msra.mxu0 %vm239_vm0, %v215_v6  ;;  %v223_v21 = vld [vmem:[%s814_s7 + $0xb0] sm:$0xff]  ;;  %v222_v23 = vld [vmem:[%s814_s7 + $0xa8] sm:$0xff]  ;;  %v221_v25 = vld [vmem:[%s814_s7 + $0xa0] sm:$0xff] }
  0x1f   : > { %557 = vmatprep.subr.msk.mxu0 %vm239_vm0, %v230_v7  ;;  %v207_v22 = vld [vmem:[%s814_s7 + $0x30] sm:$0xff]  ;;  %v206_v24 = vld [vmem:[%s814_s7 + $0x28] sm:$0xff]  ;;  %v205_v26 = vld [vmem:[%s814_s7 + $0x20] sm:$0xff] }
  0x20   : > { %v220_v27 = vld [vmem:[%s814_s7 + $0x98] sm:$0xff]  ;;  %v219_v29 = vld [vmem:[%s814_s7 + $0x90] sm:$0xff]  ;;  %v218_v31 = vld [vmem:[%s814_s7 + $0x88] sm:$0xff] }
  0x21   : > { %v204_v28 = vld [vmem:[%s814_s7 + $0x18] sm:$0xff]  ;;  %v203_v30 = vld [vmem:[%s814_s7 + $0x10] sm:$0xff]  ;;  %v202_v32 = vld [vmem:[%s814_s7 + $0x8] sm:$0xff] }
  0x22   : > { %558 = vmatpush3.xpose.msk.msra.mxu0 %vm239_vm0, %v214_v8  ;;  %v217_v33 = vld [vmem:[%s814_s7 + $0x80] sm:$0xff] }
  0x23   : > { %559 = vmatprep.subr.msk.mxu0 %vm239_vm0, %v229_v9  ;;  %v201_v34 = vld [vmem:[%s814_s7] sm:$0xff] }
  0x26   : > { %560 = vmatpush3.xpose.msk.msra.mxu0 %vm239_vm0, %v213_v10 }
  0x27   : > { %561 = vmatprep.subr.msk.mxu0 %vm239_vm0, %v228_v11 }
  0x2a   : > { %562 = vmatpush3.xpose.msk.msra.mxu0 %vm239_vm0, %v212_v12 }
  0x2b   : > { %563 = vmatprep.subr.msk.mxu0 %vm239_vm0, %v227_v13 }
  0x2e   : > { %564 = vmatpush3.xpose.msk.msra.mxu0 %vm239_vm0, %v211_v14 }
  0x2f   : > { %565 = vmatprep.subr.msk.mxu0 %vm239_vm0, %v226_v15 }
  0x32   : > { %566 = vmatpush3.xpose.msk.msra.mxu0 %vm239_vm0, %v210_v16 }
  0x33   : > { %567 = vmatprep.subr.msk.mxu0 %vm239_vm0, %v225_v17 }
  0x36   : > { %568 = vmatpush3.xpose.msk.msra.mxu0 %vm239_vm0, %v209_v18 }
  0x37   : > { %569 = vmatprep.subr.msk.mxu0 %vm239_vm0, %v224_v19 }
  0x3a   : > { %570 = vmatpush3.xpose.msk.msra.mxu0 %vm239_vm0, %v208_v20 }
  0x3b   : > { %571 = vmatprep.subr.msk.mxu0 %vm239_vm0, %v223_v21 }
  0x3e   : > { %572 = vmatpush3.xpose.msk.msra.mxu0 %vm239_vm0, %v207_v22 }
  0x3f   : > { %573 = vmatprep.subr.msk.mxu0 %vm239_vm0, %v222_v23 }
  0x42   : > { %574 = vmatpush3.xpose.msk.msra.mxu0 %vm239_vm0, %v206_v24 }
  0x43   : > { %575 = vmatprep.subr.msk.mxu0 %vm239_vm0, %v221_v25 }
  0x46   : > { %576 = vmatpush3.xpose.msk.msra.mxu0 %vm239_vm0, %v205_v26 }
  0x47   : > { %577 = vmatprep.subr.msk.mxu0 %vm239_vm0, %v220_v27 }
  0x4a   : > { %578 = vmatpush3.xpose.msk.msra.mxu0 %vm239_vm0, %v204_v28 }
  0x4b   : > { %579 = vmatprep.subr.msk.mxu0 %vm239_vm0, %v219_v29 }
  0x4e   : > { %580 = vmatpush3.xpose.msk.msra.mxu0 %vm239_vm0, %v203_v30 }
  0x4f   : > { %581 = vmatprep.subr.msk.mxu0 %vm239_vm0, %v218_v31 }
  0x52   : > { %582 = vmatpush3.xpose.msk.msra.mxu0 %vm239_vm0, %v202_v32 }
  0x53   : > { %583 = vmatprep.subr.msk.mxu0 %vm239_vm0, %v217_v33 }
  0x56   : > { %584 = vmatpush3.xpose.msk.msra.mxu0 %vm239_vm0, %v201_v34 }
  0x59   : > { %586 = vmatmul.mubr.msk.f32.vlgmr.msra.gmra.mxu0 %vm239_vm0, %v803_v0 }
  0x91   : > { %v237_v35 = vpop.permute.xlu0 %236 }
 0x119   : > { %v405_v36 = vpop.f32.mrf.mxu0 }
 0x11a   : > { %v406_v37 = vadd.f32 %v405_v36, %v237_v35 }
 0x11b   : > { %v407_v38 = vpop.f32.mrf.mxu0 }
 0x11c   : > { %410 = vst [vmem:[%s188_s11] sm:$0xff] %v406_v37  ;;  %v408_v39 = vadd.f32 %v407_v38, %v237_v35 }
 0x11e   : > { %411 = vst [vmem:[%s188_s11 + $0x8] sm:$0xff] %v408_v39 }
 0x11f   : > { %657 = shalt.err (!%p654_p5)
}
 0x120   : > { %s658_s30 = scalar_lea.hbm %s427_s23, 256  ;;  %s662_s6 = scalar_lea.hbm %s924_s3, 512 }
 0x121   : > { %p659_p6 = scmp.ne.s32.totalorder %s427_s23, %s658_s30  ;;  %p663_p10 = scmp.lt.s32.totalorder %s427_s23, %s924_s3 }
 0x122   : > { %p664_p11 = scmp.lt.s32.totalorder %s662_s6, %s658_s30 }
 0x123   : > { %p660_p7 = pnand %p659_p6, %p784_p4 }
 0x124   : > { %p665_p12 = por %p664_p11, %p663_p10 }
 0x125   : > { %p661_p9 = pneg %p660_p7 }
 0x127   : > { %p666_p13 = pnand %p665_p12, %p661_p9 }
 0x129   : > { %669 = shalt.err (!%p666_p13)
}
 0x12a   : > { %587 = dma.vmem_to_hbm [thread:$0]  (%p784_p4), %s430_s18, 256, %s427_s23, %s413_s26  }
 0x12b PF: > { %p593_p0 = scmp.ge.s32.totalorder %s720_s17, 2  ;;  %s441_s9 = sand.u32 1, %s700_s12  }
 0x12c   : > { %s442_s10 = scalar_lea.sflag [#allocation3], %s441_s9 }
 0x12d   : > { %p590_p1 = pnand %p593_p0, %p791_p8 }
 0x12f   : > { %p591_p2 = pneg %p590_p1 }
 0x131   : > { %695 = dma.done.wait (%p591_p2), %s442_s10, 256  }
 0x132   : > { %697 = vsyncadd (%p591_p2), %s442_s10, 4294967040  ;;  %s16_s17 = sadd.s32 1, %s720_s17   ;;  %s927_s12 = smov %s704_s13 }
 0x133   : > { %p13_p3 = scmp.ge.s32.totalorder %s16_s17, 4   ;;  %s928_s13 = smov %s708_s14 }
 0x134   : > { %s929_s14 = smov %s797_s25  ;;  %s930_s15 = smov %s716_s16 }
 0x135   : > { %s931_s16 = smov %s933_s20  ;;  %15 = sbr.rel (!%p13_p3) target bundleno = 4 (0x4), region = 67 }
 0x13a   :  { %447 = vsyncpa [#allocation3], 1 }
 0x13b   :  { %449 = vsyncpa [#allocation3 + $0x1], 1 }

</bundles_post_ra>
